<compile_context>
chip_gen: v6e
topology: v6e:2x2x1
jax: 0.10.0
libtpu: 0.0.40
codegen_flags: <defaults>
</compile_context>

<pallas_src>
import functools

import jax
import jax.numpy as jnp
from jax import lax
from jax.experimental import pallas as pl
from jax.experimental.pallas import tpu as pltpu

F_IN = 6
F_OUT = 5
EPS = 1e-5
DEFAULT_TILE_N = 65536   # batch rows (lanes) per grid step; multiple of 128


def artemis_kernel(wt_ref, b_ref, x_ref, o_ref):
    """One grid step in the lane-dense transposed layout.

    wt_ref: (5, 6)      column-centered folded weight, transposed (VMEM resident)
    b_ref : (5, 1)      column-centered folded bias            (VMEM resident)
    x_ref : (6, TILE_N) input tile  -- features on sublanes, batch on lanes
    o_ref : (5, TILE_N) output tile

    d[j, n] = b[j] + sum_k wT[j, k] * x[k, n]   (pure VPU broadcast-FMAs, no MXU)
    InstanceNorm mean is already folded into (wT, b), so only the biased
    sum-of-squares (sublane reduce, XLU) + rsqrt (EUP) epilogue remains.
    """
    d = b_ref[...] + wt_ref[:, 0:1] * x_ref[0:1, :]
    for k in range(1, F_IN):
        d = d + wt_ref[:, k:k + 1] * x_ref[k:k + 1, :]     # (5,1)*(1,T) -> (5,T)
    # biased variance over the 5 outputs (per-sample = per-lane)
    var = jnp.sum(d * d, axis=0, keepdims=True) * (1.0 / F_OUT)   # (1, T)
    o_ref[...] = (d * lax.rsqrt(var + EPS)).astype(o_ref.dtype)


def fold_params(params):
    """Collapse 4 chained Linears (no nonlinearity) into one affine map and
    fold InstanceNorm's mean subtraction by column-centering.

    y = x @ W_eff + b_eff ;  d = y - mean(y) = x @ W_c + b_c  with
      W_c = W_eff - mean_cols(W_eff),  b_c = b_eff - mean(b_eff).
    Returns (W_c^T, b_c) shaped for the lane-dense kernel.
    """
    (w1, b1), (w2, b2), (w3, b3), (w4, b4) = params
    w_eff = w1.T @ w2.T @ w3.T @ w4.T                       # (6, 5)
    b_eff = ((b1 @ w2.T + b2) @ w3.T + b3) @ w4.T + b4      # (5,)
    w_c = w_eff - jnp.mean(w_eff, axis=1, keepdims=True)    # column-center
    b_c = b_eff - jnp.mean(b_eff)
    return (w_c.T.astype(jnp.float32),                      # (5, 6)
            b_c.reshape(F_OUT, 1).astype(jnp.float32))      # (5, 1)


def _pick_tile(rows, max_tile=DEFAULT_TILE_N):
    """Lane-tile selection: multiple of 128 (or full extent for tiny batches),
    and >= 2 grid steps for large batches so v7x megacore has work."""
    if rows < 256:
        return int(rows)                       # single full-extent block
    half = (rows // 2) // 128 * 128            # >= 2 grid steps
    return int(max(128, min(max_tile, half)))


@functools.partial(jax.jit, static_argnames=("tile_n",))
def _artemis_jit(x, params, *, tile_n):
    B, C, F = x.shape
    rows = B * C
    wt, b = fold_params(params)                 # folded + centered inside jit
    xt = x.reshape(rows, F_IN).T                # (6, rows): lane-dense layout

    grid = (pl.cdiv(rows, tile_n),)             # ragged final block is fine
    out_t = pl.pallas_call(
        artemis_kernel,
        out_shape=jax.ShapeDtypeStruct((F_OUT, rows), jnp.float32),
        grid_spec=pltpu.PrefetchScalarGridSpec(
            num_scalar_prefetch=0,
            grid=grid,
            in_specs=[
                pl.BlockSpec((F_OUT, F_IN), lambda i: (0, 0)),    # wT (resident)
                pl.BlockSpec((F_OUT, 1), lambda i: (0, 0)),       # b  (resident)
                pl.BlockSpec((F_IN, tile_n), lambda i: (0, i)),   # x tile
            ],
            out_specs=pl.BlockSpec((F_OUT, tile_n), lambda i: (0, i)),
        ),
        compiler_params=pltpu.CompilerParams(
            dimension_semantics=("parallel",),      # megacore on v7x
            vmem_limit_bytes=48 * 1024 * 1024,      # safe on v5e/v6e/v7x
        ),
    )(wt, b, xt)
    return out_t.T.reshape(B, C, F_OUT)


def artemis_forward(x, params, max_tile_n=DEFAULT_TILE_N):
    """x: (B, 1, 6) float32. Returns (B, 1, 5) float32."""
    B, C, F = x.shape
    assert C == 1 and F == F_IN
    tile_n = _pick_tile(B * C, max_tile_n)
    return _artemis_jit(x, params, tile_n=tile_n)


def init_params(key):
    """Deterministic init matching PyTorch Linear shapes (weight: (out, in))."""
    dims = [(6, 128), (128, 256), (256, 8), (8, 5)]
    params = []
    for i, (fan_in, fan_out) in enumerate(dims):
        kw, kb = jax.random.split(jax.random.fold_in(key, i))
        bound = 1.0 / (fan_in ** 0.5)
        w = jax.random.uniform(kw, (fan_out, fan_in), jnp.float32, -bound, bound)
        b = jax.random.uniform(kb, (fan_out,), jnp.float32, -bound, bound)
        params.append((w, b))
    return params


def reference_forward(x, params):
    """Unfused layer-by-layer pure-JAX reference (matches PyTorch)."""
    B, C, F = x.shape
    h = x.reshape(B * C, F)
    for (w, b) in params:
        h = h @ w.T + b
    mean = jnp.mean(h, axis=-1, keepdims=True)
    var = jnp.mean((h - mean) ** 2, axis=-1, keepdims=True)
    return ((h - mean) / jnp.sqrt(var + 1e-5)).reshape(B, C, F_OUT)


if __name__ == "__main__":
    key = jax.random.PRNGKey(0)
    k_x, k_p, k_x2 = jax.random.split(key, 3)

    params = init_params(k_p)

    # Primary small run: (batch, channel=1, features=6), as the module expects.
    B = 2
    x = jax.random.normal(k_x, (B, 1, F_IN), dtype=jnp.float32)
    out = artemis_forward(x, params)
    jax.block_until_ready(out)
    assert out.shape == (B, 1, F_OUT)

    ref = reference_forward(x, params)
    assert jnp.allclose(out, ref, atol=1e-4, rtol=1e-4)

    # per-row mean ~ 0 after InstanceNorm
    assert jnp.all(jnp.abs(jnp.mean(out, axis=-1)) < 1e-3)

    # Secondary check: a batch that is NOT a multiple of the lane tile.
    # Exercises the multi-step grid and the ragged final block (no wrapper
    # pad / output-slice copies anymore).
    B2 = 300
    x2 = jax.random.normal(k_x2, (B2, 1, F_IN), dtype=jnp.float32)
    out2 = artemis_forward(x2, params)
    jax.block_until_ready(out2)
    ref2 = reference_forward(x2, params)
    assert out2.shape == (B2, 1, F_OUT)
    assert jnp.allclose(out2, ref2, atol=1e-3, rtol=1e-3)

    print("KERNEL_OK")
</pallas_src>

<mosaic_0001>
module attributes {stable_mosaic.version = 11 : i64} {
  func.func @artemis_kernel(%arg0: i32, %arg1: memref<5x6xf32, #tpu.memory_space<vmem>>, %arg2: memref<5x1xf32, #tpu.memory_space<vmem>>, %arg3: memref<6x2xf32, #tpu.memory_space<vmem>>, %arg4: memref<5x2xf32, #tpu.memory_space<vmem>>) attributes {dimension_semantics = [#tpu.dimension_semantics<parallel>], iteration_bounds = array<i64: 1>, scalar_prefetch = 0 : i64, scratch_operands = 0 : i64, tpu.core_type = #tpu.core_type<tc>, window_params = [{pipeline_mode = #tpu.pipeline_mode<synchronous>, transform_indices = @transform_0, window_bounds = array<i64: 5, 6>}, {pipeline_mode = #tpu.pipeline_mode<synchronous>, transform_indices = @transform_1, window_bounds = array<i64: 5, 1>}, {transform_indices = @transform_2, window_bounds = array<i64: 6, 2>}, {transform_indices = @transform_3, window_bounds = array<i64: 5, 2>}]} {
    %c0 = arith.constant 0 : index
    %c0_0 = arith.constant 0 : index
    %0 = vector.load %arg2[%c0, %c0_0] : memref<5x1xf32, #tpu.memory_space<vmem>>, vector<5x1xf32>
    %c0_1 = arith.constant 0 : index
    %c0_2 = arith.constant 0 : index
    %1 = vector.load %arg1[%c0_1, %c0_2] : memref<5x6xf32, #tpu.memory_space<vmem>>, vector<5x1xf32>
    %c0_3 = arith.constant 0 : index
    %c0_4 = arith.constant 0 : index
    %2 = vector.load %arg3[%c0_3, %c0_4] : memref<6x2xf32, #tpu.memory_space<vmem>>, vector<1x2xf32>
    %3 = vector.broadcast %1 : vector<5x1xf32> to vector<5x2xf32>
    %4 = vector.broadcast %2 : vector<1x2xf32> to vector<5x2xf32>
    %5 = arith.mulf %3, %4 : vector<5x2xf32>
    %6 = vector.broadcast %0 : vector<5x1xf32> to vector<5x2xf32>
    %7 = arith.addf %6, %5 : vector<5x2xf32>
    %c0_5 = arith.constant 0 : index
    %c1 = arith.constant 1 : index
    %8 = vector.load %arg1[%c0_5, %c1] : memref<5x6xf32, #tpu.memory_space<vmem>>, vector<5x1xf32>
    %c1_6 = arith.constant 1 : index
    %c0_7 = arith.constant 0 : index
    %9 = vector.load %arg3[%c1_6, %c0_7] : memref<6x2xf32, #tpu.memory_space<vmem>>, vector<1x2xf32>
    %10 = vector.broadcast %8 : vector<5x1xf32> to vector<5x2xf32>
    %11 = vector.broadcast %9 : vector<1x2xf32> to vector<5x2xf32>
    %12 = arith.mulf %10, %11 : vector<5x2xf32>
    %13 = arith.addf %7, %12 : vector<5x2xf32>
    %c0_8 = arith.constant 0 : index
    %c2 = arith.constant 2 : index
    %14 = vector.load %arg1[%c0_8, %c2] : memref<5x6xf32, #tpu.memory_space<vmem>>, vector<5x1xf32>
    %c2_9 = arith.constant 2 : index
    %c0_10 = arith.constant 0 : index
    %15 = vector.load %arg3[%c2_9, %c0_10] : memref<6x2xf32, #tpu.memory_space<vmem>>, vector<1x2xf32>
    %16 = vector.broadcast %14 : vector<5x1xf32> to vector<5x2xf32>
    %17 = vector.broadcast %15 : vector<1x2xf32> to vector<5x2xf32>
    %18 = arith.mulf %16, %17 : vector<5x2xf32>
    %19 = arith.addf %13, %18 : vector<5x2xf32>
    %c0_11 = arith.constant 0 : index
    %c3 = arith.constant 3 : index
    %20 = vector.load %arg1[%c0_11, %c3] : memref<5x6xf32, #tpu.memory_space<vmem>>, vector<5x1xf32>
    %c3_12 = arith.constant 3 : index
    %c0_13 = arith.constant 0 : index
    %21 = vector.load %arg3[%c3_12, %c0_13] : memref<6x2xf32, #tpu.memory_space<vmem>>, vector<1x2xf32>
    %22 = vector.broadcast %20 : vector<5x1xf32> to vector<5x2xf32>
    %23 = vector.broadcast %21 : vector<1x2xf32> to vector<5x2xf32>
    %24 = arith.mulf %22, %23 : vector<5x2xf32>
    %25 = arith.addf %19, %24 : vector<5x2xf32>
    %c0_14 = arith.constant 0 : index
    %c4 = arith.constant 4 : index
    %26 = vector.load %arg1[%c0_14, %c4] : memref<5x6xf32, #tpu.memory_space<vmem>>, vector<5x1xf32>
    %c4_15 = arith.constant 4 : index
    %c0_16 = arith.constant 0 : index
    %27 = vector.load %arg3[%c4_15, %c0_16] : memref<6x2xf32, #tpu.memory_space<vmem>>, vector<1x2xf32>
    %28 = vector.broadcast %26 : vector<5x1xf32> to vector<5x2xf32>
    %29 = vector.broadcast %27 : vector<1x2xf32> to vector<5x2xf32>
    %30 = arith.mulf %28, %29 : vector<5x2xf32>
    %31 = arith.addf %25, %30 : vector<5x2xf32>
    %c0_17 = arith.constant 0 : index
    %c5 = arith.constant 5 : index
    %32 = vector.load %arg1[%c0_17, %c5] : memref<5x6xf32, #tpu.memory_space<vmem>>, vector<5x1xf32>
    %c5_18 = arith.constant 5 : index
    %c0_19 = arith.constant 0 : index
    %33 = vector.load %arg3[%c5_18, %c0_19] : memref<6x2xf32, #tpu.memory_space<vmem>>, vector<1x2xf32>
    %34 = vector.broadcast %32 : vector<5x1xf32> to vector<5x2xf32>
    %35 = vector.broadcast %33 : vector<1x2xf32> to vector<5x2xf32>
    %36 = arith.mulf %34, %35 : vector<5x2xf32>
    %37 = arith.addf %31, %36 : vector<5x2xf32>
    %38 = arith.mulf %37, %37 : vector<5x2xf32>
    %cst = arith.constant dense<0.000000e+00> : vector<2xf32>
    %39 = vector.multi_reduction <add>, %38, %cst [0] : vector<5x2xf32> to vector<2xf32>
    %40 = vector.shape_cast %39 : vector<2xf32> to vector<1x2xf32>
    %cst_20 = arith.constant 2.000000e-01 : f32
    %41 = vector.broadcast %cst_20 : f32 to vector<1x2xf32>
    %42 = arith.mulf %40, %41 : vector<1x2xf32>
    %cst_21 = arith.constant 9.99999974E-6 : f32
    %43 = vector.broadcast %cst_21 : f32 to vector<1x2xf32>
    %44 = arith.addf %42, %43 : vector<1x2xf32>
    %45 = math.rsqrt %44 : vector<1x2xf32>
    %46 = vector.broadcast %45 : vector<1x2xf32> to vector<5x2xf32>
    %47 = arith.mulf %37, %46 : vector<5x2xf32>
    %c0_22 = arith.constant 0 : index
    %c0_23 = arith.constant 0 : index
    %48 = vector.load %arg4[%c0_22, %c0_23] : memref<5x2xf32, #tpu.memory_space<vmem>>, vector<5x2xf32>
    tpu.vector_store %arg4[%c0_22, %c0_23], %47 {strides = array<i32>} : memref<5x2xf32, #tpu.memory_space<vmem>>, vector<5x2xf32>,
    return
  }
  func.func @transform_0(%arg0: i32) -> (i32, i32) {
    %c0_i32 = arith.constant 0 : i32
    %c0_i32_0 = arith.constant 0 : i32
    %c0_i32_1 = arith.constant 0 : i32
    return %c0_i32, %c0_i32_0 : i32, i32
  }
  func.func @transform_1(%arg0: i32) -> (i32, i32) {
    %c0_i32 = arith.constant 0 : i32
    %c0_i32_0 = arith.constant 0 : i32
    %c0_i32_1 = arith.constant 0 : i32
    return %c0_i32, %c0_i32_0 : i32, i32
  }
  func.func @transform_2(%arg0: i32) -> (i32, i32) {
    %c0_i32 = arith.constant 0 : i32
    %c0_i32_0 = arith.constant 0 : i32
    return %c0_i32, %arg0 : i32, i32
  }
  func.func @transform_3(%arg0: i32) -> (i32, i32) {
    %c0_i32 = arith.constant 0 : i32
    %c0_i32_0 = arith.constant 0 : i32
    return %c0_i32, %arg0 : i32, i32
  }
}

</mosaic_0001>

<bundles_post_ra>
// kernel: _artemis_jit.1
= control target key start
LH: loop header
LB: loop body
LE: loop exit
PB: predicated region body
PF: predicated region fallthrough
CT: control target
= control target key end

     0   :  { %v127_v0 = vmov 1   ;;  %v128_v1 = vmov 0   ;;  %v129_v4 = vmov 2   ;;  %v130_v5 = vmov 3   ;;  %s180_s0 = inlined_call_operand.vmem [shape: f32[5,6], index: 0, kind: input, shape index: {}]   ;;  %s181_s1 = inlined_call_operand.vmem [shape: f32[5,1], index: 1, kind: input, shape index: {}]   ;;  %s182_s2 = inlined_call_operand.vmem [shape: f32[6,2], index: 2, kind: input, shape index: {}]   ;;  %s183_s3 = inlined_call_operand.vmem [shape: f32[5,2], index: 3, kind: output, shape index: {}]  }
   0x1   :  { %119 = vset.pattern.permute.xlu1 %v127_v0  ;;  %118 = vset.pattern.permute.xlu0 %v128_v1  ;;  %v15_v2 = vld [vmem:[%s180_s0] sm:$0x1f]  ;;  %v131_v6 = vmov 4   ;;  %v132_v7 = vmov 5   ;;  %v111_v28 = vld [vmem:[%s182_s2 + $0x5] ss:$0 sm:$0xff] }
   0x2   :  { %35 = vperm.xlu1 %119, %v15_v2   ;;  %19 = vperm.xlu0 %118, %v15_v2   ;;  %v14_v3 = vld [vmem:[%s181_s1] sm:$0x1f]  ;;  %vm89_vm0 = vcmask 12288  }
   0x3   :  { %v106_v8 = vld [vmem:[%s182_s2] ss:$0 sm:$0xff]  ;;  %v107_v12 = vld [vmem:[%s182_s2 + $0x1] ss:$0 sm:$0xff]  ;;  %v108_v13 = vld [vmem:[%s182_s2 + $0x2] ss:$0 sm:$0xff] }
   0x4   :  { %v109_v20 = vld [vmem:[%s182_s2 + $0x3] ss:$0 sm:$0xff]  ;;  %v110_v23 = vld [vmem:[%s182_s2 + $0x4] ss:$0 sm:$0xff] }
   0x6   :  { %120 = vset.pattern.permute.xlu1 %v129_v4  ;;  %29 = vperm.xlu0 %118, %v14_v3  }
   0x7   :  { %46 = vperm.xlu1 %120, %v15_v2  }
   0xa   :  { %121 = vset.pattern.permute.xlu0 %v130_v5 }
   0xb   :  { %122 = vset.pattern.permute.xlu1 %v131_v6  ;;  %57 = vperm.xlu0 %121, %v15_v2  }
   0xc   :  { %68 = vperm.xlu1 %122, %v15_v2  }
   0xf   :  { %124 = vset.pattern.permute.xlu0 %v132_v7 }
  0x10   :  { %123 = vset.pattern.permute.xlu1 %v132_v7 }
  0x11   :  { %79 = vperm.xlu1 %123, %v15_v2  }
  0x7d   :  { %v36_v9 = vpop.permute.xlu1 %35  ;;  %v20_v10 = vpop.permute.xlu0 %19 }
  0x7e   :  { %v26_v11 = vmul.f32 %v106_v8, %v20_v10  ;;  %v42_v15 = vmul.f32 %v107_v12, %v36_v9 }
  0x81   :  { %v30_v14 = vpop.permute.xlu0 %29 }
  0x82   :  { %v32_v16 = vadd.f32 %v30_v14, %v26_v11  ;;  %v47_v17 = vpop.permute.xlu1 %46 }
  0x83   :  { %v53_v18 = vmul.f32 %v108_v13, %v47_v17 }
  0x84   :  { %v43_v19 = vadd.f32 %v42_v15, %v32_v16 }
  0x86   :  { %v54_v21 = vadd.f32 %v53_v18, %v43_v19  ;;  %v58_v22 = vpop.permute.xlu0 %57 }
  0x87   :  { %v64_v24 = vmul.f32 %v109_v20, %v58_v22  ;;  %v69_v25 = vpop.permute.xlu1 %68 }
  0x88   :  { %v75_v27 = vmul.f32 %v110_v23, %v69_v25 }
  0x89   :  { %v65_v26 = vadd.f32 %v64_v24, %v54_v21 }
  0x8b   :  { %v76_v30 = vadd.f32 %v75_v27, %v65_v26 }
  0x8c   :  { %v80_v29 = vpop.permute.xlu1 %79 }
  0x8d   :  { %v86_v31 = vmul.f32 %v111_v28, %v80_v29 }
  0x8f   :  { %v87_v32 = vadd.f32 %v86_v31, %v76_v30 }
  0x91   :  { %v88_v33 = vmul.f32 %v87_v32, %v87_v32 }
  0x93   :  { %v90_v34 = vsel %vm89_vm0, %v88_v33, 0.0 }
  0x94   :  { %v91_v35 = vrot.slane %v90_v34, 4 }
  0x96   :  { %v92_v36 = vadd.f32 %v91_v35, %v90_v34 }
  0x98   :  { %v93_v37 = vrot.slane %v92_v36, 2 }
  0x9a   :  { %v94_v38 = vadd.f32 %v93_v37, %v92_v36 }
  0x9c   :  { %v95_v39 = vrot.slane %v94_v38, 1 }
  0x9e   :  { %v96_v40 = vadd.f32 %v95_v39, %v94_v38 }
  0xa0   :  { %v97_v41 = vmul.f32 0.2, %v96_v40 }
  0xa2   :  { %v98_v42 = vadd.f32 1e-05, %v97_v41 }
  0xa4   :  { %125 = vrsqrt.f32 %v98_v42 }
  0xb1   :  { %v126_v43 = vpop.eup %125 }
  0xb2   :  { %v100_v44 = vmul.f32 %v126_v43, %v87_v32 }
  0xb4   :  { %101 = vst.msk [vmem:[%s183_s3] sm:$0x1f] %vm89_vm0, %v100_v44 }

</bundles_post_ra>
